<compile_context>
chip_gen: v5e
topology: v5e:2x2
jax: 0.10.0
libtpu: 0.0.40
codegen_flags: <defaults>
</compile_context>

<pallas_src>
import jax
import jax.numpy as jnp
from jax.experimental import pallas as pl
from jax.experimental.pallas import tpu as pltpu

_NEG_F32 = float(jnp.finfo(jnp.float32).min)
_VMEM_LIMIT = 48 * 1024 * 1024        # > default scoped (16/32 MiB), < v7x 64 MiB
_BLOCK_BUDGET = 8 * 1024 * 1024       # double-buffered working-set target


# ----------------------------- kernels ------------------------------------ #

def _make_self_attn_kernel(scale_inv, has_mask, out_attn):
    def kernel(*refs):
        q_ref, k_ref, v_ref = refs[:3]
        idx = 3
        if has_mask:
            mask_ref = refs[idx]
            idx += 1
        ctx_ref = refs[idx]
        idx += 1
        attn_ref = refs[idx] if out_attn else None

        q = q_ref[...]                         # (Bt, Tq, H)
        k = k_ref[...]                         # (Bt, Sk, H)
        v = v_ref[...]                         # (Bt, Sk, H)

        # QK^T without materializing a transpose: contract the shared minor dim.
        s = jnp.einsum('bqd,bkd->bqk', q, k,
                       preferred_element_type=jnp.float32) * scale_inv
        if has_mask:
            m = mask_ref[...]                  # (Bt, 1|Tq, Sk) int8, nonzero => masked
            s = jnp.where(m != 0, _NEG_F32, s)

        # softmax over keys (torch dim=2) — lane-axis reduction
        smax = jnp.max(s, axis=-1, keepdims=True)
        e = jnp.exp(s - smax)
        denom = jnp.sum(e, axis=-1, keepdims=True)
        r = pl.reciprocal(denom, approx=True)  # EUP slot
        r = r * (2.0 - denom * r)              # one Newton step -> ~f32 accuracy
        p = e * r

        ctx = jnp.einsum('bqk,bkd->bqd', p.astype(v.dtype), v,
                         preferred_element_type=jnp.float32)
        ctx_ref[...] = ctx.astype(ctx_ref.dtype)
        if out_attn:
            attn_ref[...] = p.astype(attn_ref.dtype)
    return kernel


def _make_cca_kernel(scale_inv, has_mask, out_attn):
    def kernel(*refs):
        q_ref, k_ref, v_ref = refs[:3]
        idx = 3
        if has_mask:
            mask_ref = refs[idx]
            idx += 1
        ctx_ref = refs[idx]
        idx += 1
        attn_ref = refs[idx] if out_attn else None

        q = q_ref[...].astype(jnp.float32)     # (Bt, S, H)
        k0 = k_ref[...].astype(jnp.float32)    # (Bt, 1, H)
        v0 = v_ref[...].astype(jnp.float32)    # (Bt, 1, H)

        # bmm(q, k^T).squeeze(-1): reduce over hidden -> (Bt, S), S lane-dense.
        s = jnp.sum(q * k0, axis=-1) * scale_inv
        if has_mask:
            m = mask_ref[...][:, 0, :]         # (Bt, S) int8
            s = jnp.where(m != 0, _NEG_F32, s)

        # softmax over the sequence axis (torch dim=1) — lane-axis reduction
        smax = jnp.max(s, axis=-1, keepdims=True)
        e = jnp.exp(s - smax)
        denom = jnp.sum(e, axis=-1, keepdims=True)
        r = pl.reciprocal(denom, approx=True)
        r = r * (2.0 - denom * r)
        p = e * r                              # (Bt, S)

        # bmm(attn.unsqueeze(-1), v) == outer-product broadcast (S,1)*(1,H)
        ctx = p[:, :, None] * v0               # (Bt, S, H)
        ctx_ref[...] = ctx.astype(ctx_ref.dtype)
        if out_attn:
            # lane-dense store: last dim is S
            attn_ref[...] = p[:, None, :].astype(attn_ref.dtype)
    return kernel


# ----------------------------- tiling helpers ------------------------------ #

def _divisors(n):
    return [d for d in range(1, n + 1) if n % d == 0]


def _pick_batch_tile(B, bytes_per_batch, budget):
    """Largest divisor of B whose double-buffered working set fits the budget."""
    cap = max(1, budget // max(2 * bytes_per_batch, 1))
    bt = 1
    for d in _divisors(B):
        if d <= cap:
            bt = d
    return bt


def _pick_q_tile(S, row_bytes, fixed_bytes, budget):
    """Largest divisor of S (== S or a multiple of 8, to satisfy the (8,128)
    sublane constraint) whose double-buffered working set fits the budget."""
    candidates = [d for d in _divisors(S) if d == S or d % 8 == 0]
    if not candidates:
        return S
    fitting = [d for d in candidates if 2 * (d * row_bytes + fixed_bytes) <= budget]
    return max(fitting) if fitting else min(candidates)


def _pick_tiles(B, S, row_bytes, fixed_bytes, budget=_BLOCK_BUDGET):
    per_batch = S * row_bytes + fixed_bytes
    bt = _pick_batch_tile(B, per_batch, budget)
    tq = S
    if bt == 1 and 2 * per_batch > budget:
        tq = _pick_q_tile(S, row_bytes, fixed_bytes, budget)
    # Keep >= 2 grid steps when cheap, so "parallel" semantics can shard the
    # grid across both TensorCores (megacore / v7x).
    if bt == B and tq == S and B > 1 and B % 2 == 0:
        bt = B // 2
    return bt, tq


# ----------------------------- wrapper ------------------------------------ #

def scaled_dot_product_attention(q, k, v, scale, cca=False, mask=None,
                                 return_attn=True):
    B, S, H = q.shape
    scale_inv = 1.0 / float(scale)
    itemsize = q.dtype.itemsize
    has_mask = mask is not None

    if not cca:
        Sk = k.shape[1]
        full_mask = has_mask and mask.shape == (B, S, Sk)

        # Per-batch bytes: per-query-row part (q, ctx, attn, full-mask row) and
        # a fixed part (k, v, key-padding mask).
        row_bytes = itemsize * (2 * H + (Sk if return_attn else 0)) \
            + (Sk if full_mask else 0)
        fixed_bytes = itemsize * 2 * Sk * H + (Sk if (has_mask and not full_mask) else 0)
        bt, tq = _pick_tiles(B, S, row_bytes, fixed_bytes)

        inputs = [q, k, v]
        in_specs = [pl.BlockSpec((bt, tq, H), lambda bi, qi: (bi, qi, 0)),
                    pl.BlockSpec((bt, Sk, H), lambda bi, qi: (bi, 0, 0)),
                    pl.BlockSpec((bt, Sk, H), lambda bi, qi: (bi, 0, 0))]
        if has_mask:
            if full_mask:
                mask_in = mask.astype(jnp.int8)
                in_specs.append(
                    pl.BlockSpec((bt, tq, Sk), lambda bi, qi: (bi, qi, 0)))
            else:
                # torch path masked_fill(mask[:, 0, :]): stream only the tiny
                # (B, 1, Sk) int8 key-padding mask; broadcast in-kernel.
                mask_in = mask[:, 0, :].astype(jnp.int8).reshape(B, 1, Sk)
                in_specs.append(
                    pl.BlockSpec((bt, 1, Sk), lambda bi, qi: (bi, 0, 0)))
            inputs.append(mask_in)

        out_shape = [jax.ShapeDtypeStruct((B, S, H), q.dtype)]
        out_specs = [pl.BlockSpec((bt, tq, H), lambda bi, qi: (bi, qi, 0))]
        if return_attn:
            out_shape.append(jax.ShapeDtypeStruct((B, S, Sk), q.dtype))
            out_specs.append(pl.BlockSpec((bt, tq, Sk), lambda bi, qi: (bi, qi, 0)))

        outs = pl.pallas_call(
            _make_self_attn_kernel(scale_inv, has_mask, return_attn),
            out_shape=tuple(out_shape),
            grid_spec=pltpu.PrefetchScalarGridSpec(
                num_scalar_prefetch=0,
                grid=(B // bt, S // tq),
                in_specs=in_specs,
                out_specs=tuple(out_specs)),
            compiler_params=pltpu.CompilerParams(
                dimension_semantics=("parallel", "parallel"),
                vmem_limit_bytes=_VMEM_LIMIT),
        )(*inputs)

        ctx = outs[0]
        if S == 1:  # torch .squeeze(1) only has an effect when seq_len == 1
            ctx = jnp.squeeze(ctx, axis=1)
        if return_attn:
            return ctx, outs[1]
        return ctx

    else:
        # CCA: k, v are (B, 1, H); softmax is over the sequence axis, so each
        # batch element needs its full sequence resident -> tile batch only.
        # TODO(synk): extremely long S*H per batch element would need an
        # online (two-pass) softmax over sequence chunks; not needed here.
        bpb = itemsize * (2 * S * H + 2 * H)
        if has_mask:
            bpb += S
        if return_attn:
            bpb += itemsize * S
        bt = _pick_batch_tile(B, bpb, _BLOCK_BUDGET)
        if bt == B and B > 1 and B % 2 == 0:
            bt = B // 2

        inputs = [q, k, v]
        in_specs = [pl.BlockSpec((bt, S, H), lambda b: (b, 0, 0)),
                    pl.BlockSpec((bt, 1, H), lambda b: (b, 0, 0)),
                    pl.BlockSpec((bt, 1, H), lambda b: (b, 0, 0))]
        if has_mask:
            m2 = mask if (mask.ndim == 2 and mask.shape == (B, S)) else mask[:, 0, :]
            mask_in = m2.astype(jnp.int8).reshape(B, 1, S)
            in_specs.append(pl.BlockSpec((bt, 1, S), lambda b: (b, 0, 0)))
            inputs.append(mask_in)

        out_shape = [jax.ShapeDtypeStruct((B, S, H), q.dtype)]
        out_specs = [pl.BlockSpec((bt, S, H), lambda b: (b, 0, 0))]
        if return_attn:
            # store lane-dense as (B, 1, S); squeezed to (B, S) below.
            out_shape.append(jax.ShapeDtypeStruct((B, 1, S), q.dtype))
            out_specs.append(pl.BlockSpec((bt, 1, S), lambda b: (b, 0, 0)))

        outs = pl.pallas_call(
            _make_cca_kernel(scale_inv, has_mask, return_attn),
            out_shape=tuple(out_shape),
            grid_spec=pltpu.PrefetchScalarGridSpec(
                num_scalar_prefetch=0,
                grid=(B // bt,),
                in_specs=in_specs,
                out_specs=tuple(out_specs)),
            compiler_params=pltpu.CompilerParams(
                dimension_semantics=("parallel",),
                vmem_limit_bytes=_VMEM_LIMIT),
        )(*inputs)

        ctx = outs[0]
        if return_attn:
            return ctx, jnp.squeeze(outs[1], axis=1)   # (B, S)
        return ctx


# ----------------------------- reference ---------------------------------- #

def _ref_self(q, k, v, scale, mask=None):
    scores = jnp.einsum("bsh,bth->bst", q, k) / scale
    if mask is not None:
        m = mask if mask.shape == scores.shape else jnp.broadcast_to(
            mask[:, 0, :][:, None, :], scores.shape)
        scores = jnp.where(m, jnp.finfo(jnp.float32).min, scores)
    p = jax.nn.softmax(scores, axis=2)
    ctx = jnp.einsum("bst,bth->bsh", p, v)
    return ctx, p


def _ref_cca(q, k, v, scale, mask=None):
    scores = jnp.einsum("bsh,bth->bst", q, k)[..., 0] / scale   # (B, S)
    if mask is not None:
        m = mask if (mask.ndim == 2 and mask.shape == scores.shape) else mask[:, 0, :]
        scores = jnp.where(m, jnp.finfo(jnp.float32).min, scores)
    p = jax.nn.softmax(scores, axis=1)
    ctx = p[:, :, None] * v                                     # (B, S, H)
    return ctx, p


# ------------------------------- main -------------------------------------- #

if __name__ == "__main__":
    bs, n_head, seq_len, hid = 2, 2, 8, 32
    B = bs * n_head
    scale = float(jnp.sqrt(hid))

    key = jax.random.PRNGKey(0)
    kq, kk, kv, kkc, kvc, km = jax.random.split(key, 6)
    q = jax.random.normal(kq, (B, seq_len, hid), jnp.float32)
    k = jax.random.normal(kk, (B, seq_len, hid), jnp.float32)
    v = jax.random.normal(kv, (B, seq_len, hid), jnp.float32)

    # Tolerances account for possible reduced-precision MXU passes on f32.
    ATOL = RTOL = 1e-2

    # key-padding mask of shape (B, 1, seq_len), True = masked out
    pad_mask = jnp.zeros((B, 1, seq_len), jnp.bool_).at[:, :, seq_len - 2:].set(True)

    # --- self-attention path (cca=False) with key-padding mask ---
    ctx, attn = scaled_dot_product_attention(q, k, v, scale, cca=False, mask=pad_mask)
    jax.block_until_ready((ctx, attn))
    ctx_ref, attn_ref = _ref_self(q, k, v, scale, mask=pad_mask)
    assert ctx.shape == (B, seq_len, hid) and attn.shape == (B, seq_len, seq_len)
    assert jnp.allclose(ctx, ctx_ref, atol=ATOL, rtol=RTOL)
    assert jnp.allclose(attn, attn_ref, atol=ATOL, rtol=RTOL)

    # --- ctx-only fast path (no attention-weights writeback) ---
    ctx_only = scaled_dot_product_attention(q, k, v, scale, cca=False,
                                            mask=pad_mask, return_attn=False)
    jax.block_until_ready(ctx_only)
    assert jnp.allclose(ctx_only, ctx_ref, atol=ATOL, rtol=RTOL)

    # --- no-mask self-attention ---
    ctx_nm, attn_nm = scaled_dot_product_attention(q, k, v, scale, cca=False, mask=None)
    jax.block_until_ready((ctx_nm, attn_nm))
    ctx_nm_ref, attn_nm_ref = _ref_self(q, k, v, scale, mask=None)
    assert jnp.allclose(ctx_nm, ctx_nm_ref, atol=ATOL, rtol=RTOL)
    assert jnp.allclose(attn_nm, attn_nm_ref, atol=ATOL, rtol=RTOL)

    # --- CCA path (cca=True), k/v are emotion embeddings (B, 1, hid) ---
    k_cca = jax.random.normal(kkc, (B, 1, hid), jnp.float32)
    v_cca = jax.random.normal(kvc, (B, 1, hid), jnp.float32)
    cca_mask = jnp.zeros((B, seq_len), jnp.bool_).at[:, seq_len - 1:].set(True)

    ctx_c, attn_c = scaled_dot_product_attention(q, k_cca, v_cca, scale,
                                                 cca=True, mask=cca_mask)
    jax.block_until_ready((ctx_c, attn_c))
    ctx_c_ref, attn_c_ref = _ref_cca(q, k_cca, v_cca, scale, mask=cca_mask)
    assert ctx_c.shape == (B, seq_len, hid) and attn_c.shape == (B, seq_len)
    assert jnp.allclose(ctx_c, ctx_c_ref, atol=ATOL, rtol=RTOL)
    assert jnp.allclose(attn_c, attn_c_ref, atol=ATOL, rtol=RTOL)

    ctx_c2, attn_c2 = scaled_dot_product_attention(q, k_cca, v_cca, scale,
                                                   cca=True, mask=None)
    jax.block_until_ready((ctx_c2, attn_c2))
    ctx_c2_ref, attn_c2_ref = _ref_cca(q, k_cca, v_cca, scale, mask=None)
    assert jnp.allclose(ctx_c2, ctx_c2_ref, atol=ATOL, rtol=RTOL)
    assert jnp.allclose(attn_c2, attn_c2_ref, atol=ATOL, rtol=RTOL)

    print("KERNEL_OK")
</pallas_src>

<mosaic_0001>
module attributes {stable_mosaic.version = 11 : i64} {
  func.func @kernel(%arg0: i32, %arg1: i32, %arg2: memref<2x8x32xf32, #tpu.memory_space<vmem>>, %arg3: memref<2x8x32xf32, #tpu.memory_space<vmem>>, %arg4: memref<2x8x32xf32, #tpu.memory_space<vmem>>, %arg5: memref<2x1x8xi8, #tpu.memory_space<vmem>>, %arg6: memref<2x8x32xf32, #tpu.memory_space<vmem>>, %arg7: memref<2x8x8xf32, #tpu.memory_space<vmem>>) attributes {dimension_semantics = [#tpu.dimension_semantics<parallel>, #tpu.dimension_semantics<parallel>], iteration_bounds = array<i64: 2, 1>, scalar_prefetch = 0 : i64, scratch_operands = 0 : i64, tpu.core_type = #tpu.core_type<tc>, window_params = [{transform_indices = @transform_0, window_bounds = array<i64: 2, 8, 32>}, {transform_indices = @transform_1, window_bounds = array<i64: 2, 8, 32>}, {transform_indices = @transform_2, window_bounds = array<i64: 2, 8, 32>}, {transform_indices = @transform_3, window_bounds = array<i64: 2, 1, 8>}, {transform_indices = @transform_4, window_bounds = array<i64: 2, 8, 32>}, {transform_indices = @transform_5, window_bounds = array<i64: 2, 8, 8>}]} {
    %c0 = arith.constant 0 : index
    %c0_0 = arith.constant 0 : index
    %c0_1 = arith.constant 0 : index
    %0 = vector.load %arg2[%c0, %c0_0, %c0_1] : memref<2x8x32xf32, #tpu.memory_space<vmem>>, vector<2x8x32xf32>
    %c0_2 = arith.constant 0 : index
    %c0_3 = arith.constant 0 : index
    %c0_4 = arith.constant 0 : index
    %1 = vector.load %arg3[%c0_2, %c0_3, %c0_4] : memref<2x8x32xf32, #tpu.memory_space<vmem>>, vector<2x8x32xf32>
    %c0_5 = arith.constant 0 : index
    %c0_6 = arith.constant 0 : index
    %c0_7 = arith.constant 0 : index
    %2 = vector.load %arg4[%c0_5, %c0_6, %c0_7] : memref<2x8x32xf32, #tpu.memory_space<vmem>>, vector<2x8x32xf32>
    "tpu.trace_start"() <{level = 10 : i32, message = "bqd,bkd->bqk"}> : () -> ()
    %cst = arith.constant dense<0.000000e+00> : vector<2x8x8xf32>
    %3 = tpu.matmul %0, %1, %cst {dimension_numbers = #tpu.dot_dimension_numbers<[2], [2], [1], [1], [0, 0, 0, 1, 1, 1], [0], [0]>} : vector<2x8x32xf32>, vector<2x8x32xf32>, vector<2x8x8xf32> -> vector<2x8x8xf32>
    "tpu.trace_stop"() : () -> ()
    %cst_8 = arith.constant 0.176776692 : f32
    %4 = vector.broadcast %cst_8 : f32 to vector<2x8x8xf32>
    %5 = arith.mulf %3, %4 : vector<2x8x8xf32>
    %c0_9 = arith.constant 0 : index
    %c0_10 = arith.constant 0 : index
    %c0_11 = arith.constant 0 : index
    %6 = vector.load %arg5[%c0_9, %c0_10, %c0_11] : memref<2x1x8xi8, #tpu.memory_space<vmem>>, vector<2x1x8xi8>
    %c0_i8 = arith.constant 0 : i8
    %7 = vector.broadcast %c0_i8 : i8 to vector<2x1x8xi8>
    %8 = arith.cmpi ne, %6, %7 : vector<2x1x8xi8>
    %cst_12 = arith.constant -3.40282347E+38 : f32
    %9 = vector.shape_cast %8 : vector<2x1x8xi1> to vector<2x1x8xi1>
    %10 = vector.broadcast %9 : vector<2x1x8xi1> to vector<2x8x8xi1>
    %11 = vector.broadcast %cst_12 : f32 to vector<2x8x8xf32>
    %12 = arith.select %10, %11, %5 : vector<2x8x8xi1>, vector<2x8x8xf32>
    %cst_13 = arith.constant dense<0xFF800000> : vector<2x8xf32>
    %13 = vector.multi_reduction <maximumf>, %12, %cst_13 [2] : vector<2x8x8xf32> to vector<2x8xf32>
    %14 = vector.shape_cast %13 : vector<2x8xf32> to vector<2x8x1xf32>
    %15 = vector.broadcast %14 : vector<2x8x1xf32> to vector<2x8x8xf32>
    %16 = arith.subf %12, %15 : vector<2x8x8xf32>
    %17 = math.exp %16 : vector<2x8x8xf32>
    %cst_14 = arith.constant dense<0.000000e+00> : vector<2x8xf32>
    %18 = vector.multi_reduction <add>, %17, %cst_14 [2] : vector<2x8x8xf32> to vector<2x8xf32>
    %19 = vector.shape_cast %18 : vector<2x8xf32> to vector<2x8x1xf32>
    %20 = tpu.reciprocal %19 {approx = true} : vector<2x8x1xf32> -> vector<2x8x1xf32>
    %21 = arith.mulf %19, %20 : vector<2x8x1xf32>
    %cst_15 = arith.constant 2.000000e+00 : f32
    %22 = vector.broadcast %cst_15 : f32 to vector<2x8x1xf32>
    %23 = arith.subf %22, %21 : vector<2x8x1xf32>
    %24 = arith.mulf %20, %23 : vector<2x8x1xf32>
    %25 = vector.broadcast %24 : vector<2x8x1xf32> to vector<2x8x8xf32>
    %26 = arith.mulf %17, %25 : vector<2x8x8xf32>
    "tpu.trace_start"() <{level = 10 : i32, message = "bqk,bkd->bqd"}> : () -> ()
    %cst_16 = arith.constant dense<0.000000e+00> : vector<2x8x32xf32>
    %27 = tpu.matmul %26, %2, %cst_16 {dimension_numbers = #tpu.dot_dimension_numbers<[2], [1], [1], [2], [0, 0, 0, 1, 1, 2], [0], [0]>} : vector<2x8x8xf32>, vector<2x8x32xf32>, vector<2x8x32xf32> -> vector<2x8x32xf32>
    "tpu.trace_stop"() : () -> ()
    %c0_17 = arith.constant 0 : index
    %c0_18 = arith.constant 0 : index
    %c0_19 = arith.constant 0 : index
    %28 = vector.load %arg6[%c0_17, %c0_18, %c0_19] : memref<2x8x32xf32, #tpu.memory_space<vmem>>, vector<2x8x32xf32>
    tpu.vector_store %arg6[%c0_17, %c0_18, %c0_19], %27 {strides = array<i32>} : memref<2x8x32xf32, #tpu.memory_space<vmem>>, vector<2x8x32xf32>,
    %c0_20 = arith.constant 0 : index
    %c0_21 = arith.constant 0 : index
    %c0_22 = arith.constant 0 : index
    %29 = vector.load %arg7[%c0_20, %c0_21, %c0_22] : memref<2x8x8xf32, #tpu.memory_space<vmem>>, vector<2x8x8xf32>
    tpu.vector_store %arg7[%c0_20, %c0_21, %c0_22], %26 {strides = array<i32>} : memref<2x8x8xf32, #tpu.memory_space<vmem>>, vector<2x8x8xf32>,
    return
  }
  func.func @transform_0(%arg0: i32, %arg1: i32) -> (i32, i32, i32) {
    %c0_i32 = arith.constant 0 : i32
    %c0_i32_0 = arith.constant 0 : i32
    return %arg0, %arg1, %c0_i32 : i32, i32, i32
  }
  func.func @transform_1(%arg0: i32, %arg1: i32) -> (i32, i32, i32) {
    %c0_i32 = arith.constant 0 : i32
    %c0_i32_0 = arith.constant 0 : i32
    %c0_i32_1 = arith.constant 0 : i32
    return %arg0, %c0_i32, %c0_i32_0 : i32, i32, i32
  }
  func.func @transform_2(%arg0: i32, %arg1: i32) -> (i32, i32, i32) {
    %c0_i32 = arith.constant 0 : i32
    %c0_i32_0 = arith.constant 0 : i32
    %c0_i32_1 = arith.constant 0 : i32
    return %arg0, %c0_i32, %c0_i32_0 : i32, i32, i32
  }
  func.func @transform_3(%arg0: i32, %arg1: i32) -> (i32, i32, i32) {
    %c0_i32 = arith.constant 0 : i32
    %c0_i32_0 = arith.constant 0 : i32
    %c0_i32_1 = arith.constant 0 : i32
    return %arg0, %c0_i32, %c0_i32_0 : i32, i32, i32
  }
  func.func @transform_4(%arg0: i32, %arg1: i32) -> (i32, i32, i32) {
    %c0_i32 = arith.constant 0 : i32
    %c0_i32_0 = arith.constant 0 : i32
    return %arg0, %arg1, %c0_i32 : i32, i32, i32
  }
  func.func @transform_5(%arg0: i32, %arg1: i32) -> (i32, i32, i32) {
    %c0_i32 = arith.constant 0 : i32
    %c0_i32_0 = arith.constant 0 : i32
    return %arg0, %arg1, %c0_i32 : i32, i32, i32
  }
}

</mosaic_0001>

<bundles_post_ra>
// kernel: tpu_custom_call.1
= control target key start
LH: loop header
LB: loop body
LE: loop exit
PB: predicated region body
PF: predicated region fallthrough
CT: control target
= control target key end

     0   :  { %s1328_s0 = inlined_call_operand.hbm [shape: f32[4,8,32], index: 0, kind: input, shape index: {}]   ;;  %s1329_s1 = inlined_call_operand.hbm [shape: f32[4,8,32], index: 1, kind: input, shape index: {}]   ;;  %s1330_s2 = inlined_call_operand.hbm [shape: f32[4,8,32], index: 2, kind: input, shape index: {}]   ;;  %s1331_s3 = inlined_call_operand.vmem [shape: s8[4,1,8], index: 3, kind: input, shape index: {}]   ;;  %s1332_s4 = inlined_call_operand.hbm [shape: f32[4,8,32], index: 4, kind: output, shape index: {0}]   ;;  %s1333_s5 = inlined_call_operand.hbm [shape: f32[4,8,8], index: 5, kind: output, shape index: {1}]  }
   0x1   :  { %1341 = sst [smem:[#allocation22_spill]] %s1329_s1 }
   0x2   :  { %11 = vsyncpa [#allocation3], 0 }
   0x3   :  { %13 = vsyncpa [#allocation3 + $0x1], 0 }
   0x4   :  { %14 = vsyncpa [#allocation6], 0 }
   0x5   :  { %16 = vsyncpa [#allocation6 + $0x1], 0 }
   0x6   :  { %17 = vsyncpa [#allocation4], 0 }
   0x7   :  { %19 = vsyncpa [#allocation4 + $0x1], 0 }
   0x8   :  { %20 = vsyncpa [#allocation10], 0 }
   0x9   :  { %22 = vsyncpa [#allocation10 + $0x1], 0  ;;  %s1126_s18 = smov 0   ;;  %s1128_s19 = smov 0  }
   0xa   :  { %s1130_s20 = smov 0   ;;  %s1132_s21 = smov 0  }
   0xb   :  { %s1134_s22 = smov 0   ;;  %s1136_s23 = smov 0  }
   0xc LB: > { %1342 = sst [smem:[#allocation15_spill]] %s1069_s18  ;;  %s1157_s24 = sadd.s32 4294967295, %s1089_s23   ;;  %s1089_s23 = sphi %s1136_s23, %s28_s23   ;;  %s1085_s22 = sphi %s1134_s22, %s1362_s22   ;;  %s1081_s21 = sphi %s1132_s21, %s1361_s21   ;;  %s1077_s20 = sphi %s1130_s20, %s1360_s20   ;;  %s1073_s19 = sphi %s1128_s19, %s1364_s19   ;;  %s1069_s18 = sphi %s1126_s18, %s1363_s18  }
   0xd   : > { %1343 = sst [smem:[#allocation16_spill]] %s1077_s20  ;;  %s753_s25 = sadd.s32 4294967294, %s1089_s23  }
   0xe   : > { %1344 = sst [smem:[#allocation17_spill]] %s1085_s22  ;;  %s40_s26 = sadd.s32 1, %s1085_s22 }
   0xf   : > { %1345 = sst [smem:[#allocation18_spill]] %s1089_s23  ;;  %s49_s27 = sadd.s32 1, %s1077_s20 }
  0x10   : > { %p42_p0 = scmp.ge.s32.totalorder %s40_s26, 2  ;;  %p56_p1 = scmp.ne.s32.totalorder %s1077_s20, %s1073_s19 }
  0x11   : > { %p57_p2 = scmp.eq.s32.totalorder %s1089_s23, 0  ;;  %p62_p3 = scmp.ne.s32.totalorder %s1073_s19, %s1069_s18 }
  0x12   : > { %s1366_s26 = smov (%p42_p0, %s40_s26), 0  ;;  %p63_p5 = scmp.eq.s32.totalorder %s1157_s24, 0 }
  0x13   : > { %1346 = sst [smem:[#allocation19_spill]] %s1366_s26  ;;  %p1169_p4 = por %p57_p2, %p56_p1 }
  0x14   : > { %s44_s29 = ssub.s32 %s1085_s22, %s1366_s26  ;;  %p166_p6 = scmp.eq.s32.totalorder %s1157_s24, 1 }
  0x15   : > { %p47_p7 = scmp.eq.s32.totalorder %s44_s29, 0  ;;  %p1177_p8 = por %p63_p5, %p62_p3 }
  0x16   : > { %p1181_p9 = por %p166_p6, %p56_p1  ;;  %p172_p10 = scmp.eq.s32.totalorder %s753_s25, 1 }
  0x17   : > { %s1186_s7 = scalar_select %p47_p7, %s1077_s20, %s49_s27  }
  0x18   : > { %p1188_p11 = por %p172_p10, %p62_p3  ;;  %p755_p12 = scmp.ge.s32.totalorder %s1089_s23, 2 }
  0x19   : > { %1350 = sst [smem:[#allocation20_spill]] %s1186_s7  ;;  %p818_p13 = scmp.lt.s32.totalorder %s1089_s23, 2 }
  0x1a   : > { %s1351_s8 = scalar_select %p1188_p11, 1, 0 }
  0x1b   : > { %s220_s9 = sand.u32 1, %s1077_s20   ;;  %s786_s11 = sshll.u32 %s1085_s22, 4 }
  0x1c   : > { %1352 = sst [smem:[#allocation21_spill]] %s1351_s8  ;;  %s1195_s10 = sshll.u32 %s220_s9, 4 }
  0x1d   : > { %p1200_p0 = pnand %p818_p13, %p1169_p4  ;;  %s243_s13 = sand.u32 1, %s1089_s23  }
  0x1e   : > { %s1354_s1 = sld [smem:[#allocation22_spill]]  ;;  %s247_s25 = scalar_lea.vmem [#allocation5], %s1195_s10 }
  0x1f   : > { %s255_s27 = sshll.u32 %s247_s25, 4  ;;  %s244_s29 = scalar_lea.sflag [#allocation6], %s243_s13  ;;  %s256_s27 = int_to_ptr.vmem [resolvable:$true] %s255_s27 }
  0x20   : > { %s1091_s26 = smov 128   ;;  %s1092_s28 = smov 8  }
  0x21   : > { %p765_p1 = scmp.ge.s32.totalorder %s1089_s23, 1  ;;  %p293_p2 = scmp.lt.s32.totalorder %s1089_s23, 3 }
  0x22   : > { %s221_s13 = scalar_lea.sflag [#allocation3], %s220_s9  ;;  %s274_s20 = scalar_lea.hbm %s1330_s2, %s786_s11 }
  0x23   : > { %p1213_p3 = pnand %p765_p1, %p293_p2  ;;  %s275_s23 = sshll.u32 %s274_s20, 4  ;;  %s276_s23 = int_to_ptr.hbm [resolvable:$true] %s275_s23 }
  0x24   : > { %s252_s16 = scalar_lea.hbm %s1354_s1, %s786_s11  ;;  %s224_s1 = scalar_lea.vmem [#allocation2], %s1195_s10 }
  0x25   : > { %s253_s17 = sshll.u32 %s252_s16, 4  ;;  %s230_s16 = scalar_lea.hbm %s1328_s0, %s786_s11  ;;  %s254_s17 = int_to_ptr.hbm [resolvable:$true] %s253_s17 }
  0x26   : > { %807 = dma.hbm_to_vmem [thread:$0]  (!%p1200_p0), %s254_s17, 256, %s256_s27, %s244_s29, %s1091_s26, %s1091_s26, %s1092_s28  }
  0x27   : > { %s231_s25 = sshll.u32 %s230_s16, 4  ;;  %s233_s7 = sshll.u32 %s224_s1, 4  ;;  %s232_s25 = int_to_ptr.hbm [resolvable:$true] %s231_s25  ;;  %s234_s7 = int_to_ptr.vmem [resolvable:$true] %s233_s7 }
  0x28   : > { %804 = dma.hbm_to_vmem [thread:$0]  (!%p1200_p0), %s232_s25, 256, %s234_s7, %s221_s13, %s1091_s26, %s1091_s26, %s1092_s28  }
  0x29   : > { %s269_s8 = scalar_lea.vmem [#allocation7], %s1195_s10  ;;  %297 = sbr.rel (%p1213_p3) target bundleno = 586 (0x24a), region = 36 }
  0x2a   : > { %s277_s18 = sshll.u32 %s269_s8, 4  ;;  %s1232_s1 = sand.u32 (!%p1213_p3), 1, %s1073_s19   ;;  %s278_s18 = int_to_ptr.vmem [resolvable:$true] %s277_s18 }
  0x2b   : > { %810 = dma.hbm_to_vmem [thread:$0]  (!%p1200_p0), %s276_s23, 256, %s278_s18, %s244_s29, %s1091_s26, %s1091_s26, %s1092_s28  }
  0x2c   : > { %s1235_s7 = sshll.u32 (!%p1213_p3), %s1232_s1, 4  ;;  %s300_s9 = scalar_lea.sflag (!%p1213_p3), [#allocation3], %s1232_s1 }
  0x2d   : > { %s303_s20 = scalar_lea.vmem (!%p1213_p3), [#allocation2], %s1235_s7 }
  0x2e   : > { %1052 = dma.done.wait (%p1177_p8), %s300_s9, 256  }
  0x2f   : > { %1054 = vsyncadd (%p1177_p8), %s300_s9, 4294967040  ;;  %s309_s18 = sand.u32 1, %s1157_s24   ;;  %s313_s23 = scalar_lea.vmem [#allocation5], %s1235_s7 }
  0x30   : > { %s310_s22 = scalar_lea.sflag [#allocation6], %s309_s18 }
  0x31   : > { %1056 = dma.done.wait (%p1177_p8), %s310_s22, 512  }
  0x32   : > { %1058 = vsyncadd (%p1177_p8), %s310_s22, 4294966784  ;;  %vm388_vm0 = vcmask 261120   ;;  %v384_v0 = vld [vmem:[%s313_s23] sm:$0xff]  ;;  %v385_v1 = vld [vmem:[%s313_s23 + $0x8] sm:$0xff]  ;;  %s771_s24 = sshll.u32 %s1081_s21, 1  ;;  %v1093_v6 = vmov 0  }
  0x33   : > { %772 = vmatpush.xpose.msk.msra.mxu0 %vm388_vm0, %v384_v0  ;;  %v382_v2 = vld [vmem:[%s303_s20] sm:$0xff]  ;;  %774 = vmatpush.xpose.msk.msra.mxu1 %vm388_vm0, %v385_v1  ;;  %v383_v3 = vld [vmem:[%s303_s20 + $0x8] sm:$0xff]  ;;  %p374_p4 = scmp.lt.s32.totalorder %s771_s24, 3  ;;  %vm461_vm6 = vcmask 64512   ;;  %s323_s10 = scalar_lea.vmem [#allocation7], %s1235_s7 }
  0x34   : > { %v386_v33 = vld [vmem:[%s323_s10] sm:$0xff]  ;;  %v387_v34 = vld [vmem:[%s323_s10 + $0x8] sm:$0xff]  ;;  %s369_s11 = scalar_lea.vmem [#allocation9], %s1235_s7  ;;  %s789_s12 = sshll.u32 %s1081_s21, 4 }
  0x35   : > { %s1368_s24 = smov (!%p374_p4, %s771_s24), 3  ;;  %508 = vmatpush.msra.mxu2 %v386_v33  ;;  %531 = vmatpush.msra.mxu3 %v387_v34  ;;  %s577_s29 = sshll.u32 %s369_s11, 4  ;;  %s578_s29 = int_to_ptr.vmem [resolvable:$true] %s577_s29 }
  0x36   : > { %773 = vmatmul.msk.f32.vlgmr.msra.gmra.mxu0 %vm388_vm0, %v382_v2  ;;  %775 = vmatmul.msk.f32.vlgmr.msra.gmra.mxu1 %vm388_vm0, %v383_v3  ;;  %s376_s8 = scalar_lea.vmem %s1331_s3, %s1368_s24  ;;  %s576_s15 = scalar_lea.hbm %s1333_s5, %s789_s12 }
  0x37   : > { %v443_v4 = vld [vmem:[%s376_s8] sm:$0x1]  ;;  %v444_v5 = vld [vmem:[%s376_s8 + $0x1] sm:$0x1]  ;;  %s579_s16 = sshll.u32 %s576_s15, 4  ;;  %s546_s25 = scalar_lea.sflag [#allocation10], %s1232_s1  ;;  %s580_s16 = int_to_ptr.hbm [resolvable:$true] %s579_s16 }
  0x38   : > { %vm445_vm1 = vnez %v443_v4  ;;  %vm446_vm2 = vnez %v444_v5  ;;  %s985_s13 = sshra.s32 %s580_s16, 4  ;;  %s991_s21 = scalar_lea.hbm %s1333_s5, 32  ;;  %s986_s13 = int_to_ptr.hbm [resolvable:$true] %s985_s13 }
  0x39   : > { %v447_v7 = vsel %vm445_vm1, 16843009, %v1093_v6  ;;  %v448_v9 = vsel %vm446_vm2, 16843009, %v1093_v6  ;;  %s987_s17 = scalar_lea.hbm %s986_s13, 16  ;;  %p992_p8 = scmp.lt.s32.totalorder %s986_s13, %s1333_s5 }
  0x3a   : > { %v449_v8 = vunpack.c.0.s8 %v447_v7  ;;  %v450_v10 = vunpack.c.0.s8 %v448_v9  ;;  %p988_p5 = scmp.ne.s32.totalorder %s986_s13, %s987_s17  ;;  %p993_p10 = scmp.lt.s32.totalorder %s991_s21, %s987_s17 }
  0x3c   : > { %vm451_vm3 = vcmp.ne.s32.totalorder %v449_v8, 0  ;;  %vm452_vm4 = vcmp.ne.s32.totalorder %v450_v10, 0  ;;  %p989_p6 = pnand %p988_p5, %p1181_p9  ;;  %p994_p13 = por %p993_p10, %p992_p8 }
  0x3d   : > { %v453_v11 = vsel %vm451_vm3, 1, %v1093_v6  ;;  %v454_v13 = vsel %vm452_vm4, 1, %v1093_v6 }
  0x3e   : > { %v455_v12 = vperm.slane %v453_v11, 0  ;;  %v456_v16 = vperm.slane %v454_v13, 0  ;;  %p990_p7 = pneg %p989_p6 }
  0x40   : > { %vm457_vm5 = vcmp.eq.s32.totalorder %v455_v12, 1  ;;  %vm458_vm7 = vcmp.eq.s32.totalorder %v456_v16, 1  ;;  %p995_p0 = pnand %p994_p13, %p990_p7 }
  0xb3   : > { %v412_v14 = vpop.f32.mrf.mxu0  ;;  %v438_v15 = vpop.f32.mrf.mxu1 }
  0xb4   : > { %v441_v17 = vmul.f32 0.17677669, %v412_v14  ;;  %v442_v19 = vmul.f32 0.17677669, %v438_v15 }
  0xb6   : > { %v459_v18 = vsel %vm457_vm5, -3.4028235e+38, %v441_v17  ;;  %v460_v21 = vsel %vm458_vm7, -3.4028235e+38, %v442_v19 }
  0xb7   : > { %v462_v20 = vsel %vm461_vm6, %v459_v18, -inf  ;;  %v465_v22 = vsel %vm461_vm6, %v460_v21, -inf }
  0xb8   : > { %463 = vmax.xlane.f32.xlu0 %v462_v20 }
  0xc0   : > { %466 = vmax.xlane.f32.xlu0 %v465_v22 }
 0x12b   : > { %v464_v23 = vpop.xlane.xlu0 %463 }
 0x12c   : > { %v468_v24 = vsub.f32 %v459_v18, %v464_v23 }
 0x12e   : > { %v470_v25 = vmul.f32 1.442695, %v468_v24 }
 0x130   : > { %873 = vpow2.f32 %v470_v25 }
 0x133   : > { %v467_v26 = vpop.xlane.xlu0 %466 }
 0x134   : > { %v469_v27 = vsub.f32 %v460_v21, %v467_v26 }
 0x136   : > { %v874_v28 = vpop.eup %873  ;;  %v472_v29 = vmul.f32 1.442695, %v469_v27 }
 0x137   : > { %v474_v30 = vsel %vm461_vm6, %v874_v28, 0.0 }
 0x138   : > { %875 = vpow2.f32 %v472_v29  ;;  %475 = vadd.xlane.f32.xlu1 %v474_v30 }
 0x13e   : > { %v876_v31 = vpop.eup %875 }
 0x13f   : > { %v477_v32 = vsel %vm461_vm6, %v876_v31, 0.0 }
 0x140   : > { %478 = vadd.xlane.f32.xlu1 %v477_v32 }
 0x1ab   : > { %v476_v35 = vpop.xlane.xlu1 %475 }
 0x1ac   : > { %877 = vrcp.f32 %v476_v35 }
 0x1b2   : > { %v878_v36 = vpop.eup %877 }
 0x1b3   : > { %v482_v37 = vmul.f32 %v878_v36, %v476_v35  ;;  %v479_v38 = vpop.xlane.xlu1 %478 }
 0x1b4   : > { %879 = vrcp.f32 %v479_v38 }
 0x1b5   : > { %v484_v39 = vsub.f32 2.0, %v482_v37 }
 0x1b7   : > { %v486_v40 = vmul.f32 %v878_v36, %v484_v39 }
 0x1b9   : > { %v488_v41 = vmul.f32 %v874_v28, %v486_v40 }
 0x1ba   : > { %v880_v42 = vpop.eup %879 }
 0x1bb   : > { %v483_v43 = vmul.f32 %v880_v42, %v479_v38  ;;  %776 = vmatmul.msk.f32.vlgmr.msra.gmra.mxu2 %vm461_vm6, %v488_v41  ;;  %538 = vst.msk [vmem:[%s369_s11] sm:$0xff] %vm461_vm6, %v488_v41 }
 0x1bd   : > { %v485_v44 = vsub.f32 2.0, %v483_v43 }
 0x1bf   : > { %v487_v45 = vmul.f32 %v880_v42, %v485_v44 }
 0x1c1   : > { %v489_v46 = vmul.f32 %v876_v31, %v487_v45 }
 0x1c3   : > { %777 = vmatmul.msk.f32.vlgmr.msra.gmra.mxu3 %vm461_vm6, %v489_v46  ;;  %539 = vst.msk [vmem:[%s369_s11 + $0x8] sm:$0xff] %vm461_vm6, %v489_v46 }
 0x1c4   : > { %998 = shalt.err (!%p995_p0)
}
 0x1c5   : > { %s1094_s22 = smov 128   ;;  %s1095_s23 = smov 8  }
 0x1c6   : > { %798 = dma.vmem_to_hbm [thread:$0]  (%p1181_p9), %s578_s29, 256, %s580_s16, %s546_s25, %s1094_s22, %s1094_s22, %s1095_s23  }
 0x1c7   : > { %s362_s24 = scalar_lea.vmem [#allocation8], %s1235_s7  ;;  %s558_s8 = scalar_lea.hbm %s1332_s4, %s789_s12 }
 0x1c8   : > { %s559_s10 = sshll.u32 %s362_s24, 4  ;;  %s561_s11 = sshll.u32 %s558_s8, 4  ;;  %s560_s10 = int_to_ptr.vmem [resolvable:$true] %s559_s10  ;;  %s562_s11 = int_to_ptr.hbm [resolvable:$true] %s561_s11 }
 0x1c9   : > { %s541_s28 = scalar_lea.sflag [#allocation4], %s1232_s1  ;;  %s1013_s14 = sshra.s32 %s562_s11, 4  ;;  %s1014_s14 = int_to_ptr.hbm [resolvable:$true] %s1013_s14 }
 0x1ca   : > { %s1015_s29 = scalar_lea.hbm %s1014_s14, 16  ;;  %s1019_s16 = scalar_lea.hbm %s1332_s4, 32 }
 0x1cb   : > { %p1016_p1 = scmp.ne.s32.totalorder %s1014_s14, %s1015_s29  ;;  %p1020_p4 = scmp.lt.s32.totalorder %s1014_s14, %s1332_s4 }
 0x1cc   : > { %p1021_p5 = scmp.lt.s32.totalorder %s1019_s16, %s1015_s29 }
 0x1cd   : > { %p1017_p2 = pnand %p1016_p1, %p1181_p9 }
 0x1ce   : > { %p1022_p6 = por %p1021_p5, %p1020_p4 }
 0x1cf   : > { %p1018_p3 = pneg %p1017_p2 }
 0x1d1   : > { %p1023_p7 = pnand %p1022_p6, %p1018_p3 }
 0x23e   : > { %v510_v47 = vpop.f32.mrf.mxu2 }
 0x23f   : > { %536 = vst.msk [vmem:[%s362_s24] sm:$0xff] %vm388_vm0, %v510_v47 }
 0x246   : > { %v533_v48 = vpop.f32.mrf.mxu3 }
 0x247   : > { %537 = vst.msk [vmem:[%s362_s24 + $0x8] sm:$0xff] %vm388_vm0, %v533_v48 }
 0x248   : > { %1026 = shalt.err (!%p1023_p7)
}
 0x249   : > { %797 = dma.vmem_to_hbm [thread:$0]  (%p1181_p9), %s560_s10, 256, %s562_s11, %s541_s28, %s1094_s22, %s1094_s22, %s1095_s23  }
 0x24a PF: > { %s1356_s1 = sld [smem:[#allocation15_spill]]  ;;  %p812_p8 = pnand %p755_p12, %p1188_p11 }
 0x24b   : > { %s1358_s17 = sld [smem:[#allocation18_spill]] }
 0x24c   : > { %p813_p10 = pneg %p812_p8 }
 0x250   : > { %s594_s27 = sand.u32 1, %s1356_s1  }
 0x251   : > { %s595_s9 = scalar_lea.sflag [#allocation4], %s594_s27 }
 0x252   : > { %1060 = dma.done.wait (%p813_p10), %s595_s9, 256  }
 0x253   : > { %1062 = vsyncadd (%p813_p10), %s595_s9, 4294967040  ;;  %s605_s21 = scalar_lea.sflag [#allocation10], %s594_s27 }
 0x254   : > { %1064 = dma.done.wait (%p813_p10), %s605_s21, 256  }
 0x255   : > { %1066 = vsyncadd (%p813_p10), %s605_s21, 4294967040  ;;  %s28_s23 = sadd.s32 1, %s1358_s17   ;;  %s1359_s6 = sld [smem:[#allocation16_spill]] }
 0x256   : > { %p25_p13 = scmp.ge.s32.totalorder %s28_s23, 4   ;;  %s1360_s20 = sld [smem:[#allocation20_spill]] }
 0x257   : > { %s1361_s21 = sld [smem:[#allocation17_spill]]  ;;  %s1363_s18 = smov %s1073_s19 }
 0x258   : > { %s1362_s22 = sld [smem:[#allocation19_spill]]  ;;  %27 = sbr.rel (!%p25_p13) target bundleno = 12 (0xc), region = 125 }
 0x25b   : > { %s1364_s19 = smov %s1359_s6 }
 0x25d   :  { %611 = vsyncpa [#allocation3], 1 }
 0x25e   :  { %613 = vsyncpa [#allocation3 + $0x1], 1 }
 0x25f   :  { %614 = vsyncpa [#allocation6], 1 }
 0x260   :  { %616 = vsyncpa [#allocation6 + $0x1], 1 }
 0x261   :  { %617 = vsyncpa [#allocation4], 1 }
 0x262   :  { %619 = vsyncpa [#allocation4 + $0x1], 1 }
 0x263   :  { %620 = vsyncpa [#allocation10], 1 }
 0x264   :  { %622 = vsyncpa [#allocation10 + $0x1], 1 }

</bundles_post_ra>
